<compile_context>
chip_gen: v6e
topology: v6e:2x2x1
jax: 0.10.0
libtpu: 0.0.40
codegen_flags: <defaults>
</compile_context>

<pallas_src>
import numpy as np
import jax
import jax.numpy as jnp
from jax.experimental import pallas as pl
from jax.experimental.pallas import tpu as pltpu


def _make_critic_kernel(num_linear_layers, compute_dtype=None):
    """Build a fused MLP kernel: refs = (x, w0, b0, w1, b1, ..., o)."""

    def kernel(*refs):
        x_ref = refs[0]
        o_ref = refs[-1]
        wb_refs = refs[1:-1]
        assert len(wb_refs) == 2 * num_linear_layers

        h = x_ref[...]  # already in the streaming dtype; no redundant cast
        for i in range(num_linear_layers):
            w = wb_refs[2 * i][...]
            b = wb_refs[2 * i + 1][...]
            if compute_dtype is not None and w.dtype != compute_dtype:
                w = w.astype(compute_dtype)
            # MXU matmul, f32 accumulation; bias broadcast over the batch tile.
            h = jnp.dot(h, w, preferred_element_type=jnp.float32) + b
            if i < num_linear_layers - 1:
                h = jnp.maximum(h, 0.0)  # ReLU on hidden layers only (VPU)
                if compute_dtype is not None:
                    h = h.astype(compute_dtype)
        o_ref[...] = h.astype(o_ref.dtype)

    return kernel


def critic_forward(x, params, *, block_batch=1024, compute_dtype=None):
    """Run the fused Critic MLP as a single batch-tiled Pallas kernel.

    x:      (batch, input_dim) float32
    params: list of (W, b) with W:(in, out) float32, b:(1, out) float32
    block_batch: max rows per grid step (rounded to a multiple of 8)
    compute_dtype: e.g. jnp.bfloat16 to halve x streaming bytes on v6e/v7x
                   (accumulation stays f32). None keeps everything f32.
    returns (batch, 1) float32
    """
    batch, input_dim = x.shape
    out_dim = params[-1][0].shape[1]

    # Batch tile: multiple of 8 (f32 sublane), no larger than needed.
    padded8 = -(-batch // 8) * 8
    tb = max(8, (min(block_batch, padded8) // 8) * 8)
    padded_batch = -(-batch // tb) * tb

    x_in = x
    if compute_dtype is not None:
        x_in = x_in.astype(compute_dtype)
    if padded_batch != batch:
        # Zero-pad the batch tail; pad rows flow harmlessly through the MLP
        # and are sliced off below.
        x_in = jnp.zeros((padded_batch, input_dim), x_in.dtype).at[:batch].set(x_in)

    flat = []
    for w, b in params:
        flat.append(w)
        flat.append(b)

    grid = (padded_batch // tb,)

    # x / out tiled over batch; weights & biases resident (constant index_map).
    in_specs = [pl.BlockSpec((tb, input_dim), lambda i: (i, 0))]
    for w, b in params:
        in_specs.append(pl.BlockSpec(w.shape, lambda i: (0, 0)))
        in_specs.append(pl.BlockSpec(b.shape, lambda i: (0, 0)))
    out_spec = pl.BlockSpec((tb, out_dim), lambda i: (i, 0))

    # Advisory cost hint for XLA scheduling around the custom call.
    flops = 2 * padded_batch * sum(w.shape[0] * w.shape[1] for w, _ in params)
    bytes_accessed = (
        x_in.size * x_in.dtype.itemsize
        + padded_batch * out_dim * 4
        + sum(w.size * w.dtype.itemsize + b.size * b.dtype.itemsize
              for w, b in params)
    )

    out = pl.pallas_call(
        _make_critic_kernel(len(params), compute_dtype),
        out_shape=jax.ShapeDtypeStruct((padded_batch, out_dim), jnp.float32),
        grid=grid,
        in_specs=in_specs,
        out_specs=out_spec,
        compiler_params=pltpu.CompilerParams(
            dimension_semantics=("parallel",)),  # v7x: shard batch over 2 TCs
        cost_estimate=pl.CostEstimate(
            flops=flops, transcendentals=0, bytes_accessed=bytes_accessed),
    )(x_in, *flat)

    return out[:batch]


def init_linear(key, in_dim, out_dim):
    """Deterministic init mimicking PyTorch nn.Linear default (U[-1/sqrt(in), 1/sqrt(in)])."""
    kw, kb = jax.random.split(key)
    bound = 1.0 / np.sqrt(in_dim)
    w = jax.random.uniform(kw, (in_dim, out_dim), jnp.float32, -bound, bound)
    b = jax.random.uniform(kb, (1, out_dim), jnp.float32, -bound, bound)
    return w, b


def build_critic_params(key, input_dim, critic_dims):
    dims = [input_dim] + list(critic_dims) + [1]  # final fc -> scalar value
    params = []
    for i in range(len(dims) - 1):
        key, sub = jax.random.split(key)
        params.append(init_linear(sub, dims[i], dims[i + 1]))
    return params


def critic_reference(x, params):
    """Pure-JAX reference for correctness checking."""
    h = x
    n = len(params)
    for i, (w, b) in enumerate(params):
        h = h @ w + b
        if i < n - 1:
            h = jnp.maximum(h, 0.0)
    return h


if __name__ == "__main__":
    # Small shapes consistent with the module's forward:
    #   input_dim=16, critic_dims=(32, 32). batch=50 with block_batch=32
    #   exercises the batch grid (2 tiles) AND the tail-padding path.
    # action_dim is unused in Critic.forward (PyTorch ctor ignores it too).
    batch = 50
    input_dim = 16
    action_dim = 4  # unused
    critic_dims = (32, 32)

    key = jax.random.PRNGKey(0)
    key_x, key_p = jax.random.split(key)

    x = jax.random.normal(key_x, (batch, input_dim), dtype=jnp.float32)
    params = build_critic_params(key_p, input_dim, critic_dims)

    out = critic_forward(x, params, block_batch=32)  # f32 path for tight check
    out = jax.block_until_ready(out)

    ref = critic_reference(x, params)
    assert out.shape == (batch, 1)
    np.testing.assert_allclose(np.asarray(out), np.asarray(ref), rtol=1e-5, atol=1e-5)

    print("KERNEL_OK")
</pallas_src>

<mosaic_0001>
module attributes {stable_mosaic.version = 11 : i64} {
  func.func @kernel(%arg0: i32, %arg1: memref<32x16xf32, #tpu.memory_space<vmem>>, %arg2: memref<16x32xf32, #tpu.memory_space<vmem>>, %arg3: memref<1x32xf32, #tpu.memory_space<vmem>>, %arg4: memref<32x32xf32, #tpu.memory_space<vmem>>, %arg5: memref<1x32xf32, #tpu.memory_space<vmem>>, %arg6: memref<32x1xf32, #tpu.memory_space<vmem>>, %arg7: memref<1x1xf32, #tpu.memory_space<vmem>>, %arg8: memref<32x1xf32, #tpu.memory_space<vmem>>) attributes {dimension_semantics = [#tpu.dimension_semantics<parallel>], iteration_bounds = array<i64: 2>, scalar_prefetch = 0 : i64, scratch_operands = 0 : i64, tpu.core_type = #tpu.core_type<tc>, window_params = [{transform_indices = @transform_0, window_bounds = array<i64: 32, 16>}, {pipeline_mode = #tpu.pipeline_mode<synchronous>, transform_indices = @transform_1, window_bounds = array<i64: 16, 32>}, {pipeline_mode = #tpu.pipeline_mode<synchronous>, transform_indices = @transform_2, window_bounds = array<i64: 1, 32>}, {pipeline_mode = #tpu.pipeline_mode<synchronous>, transform_indices = @transform_3, window_bounds = array<i64: 32, 32>}, {pipeline_mode = #tpu.pipeline_mode<synchronous>, transform_indices = @transform_4, window_bounds = array<i64: 1, 32>}, {pipeline_mode = #tpu.pipeline_mode<synchronous>, transform_indices = @transform_5, window_bounds = array<i64: 32, 1>}, {pipeline_mode = #tpu.pipeline_mode<synchronous>, transform_indices = @transform_6, window_bounds = array<i64: 1, 1>}, {transform_indices = @transform_7, window_bounds = array<i64: 32, 1>}]} {
    %c0 = arith.constant 0 : index
    %c0_0 = arith.constant 0 : index
    %0 = vector.load %arg1[%c0, %c0_0] : memref<32x16xf32, #tpu.memory_space<vmem>>, vector<32x16xf32>
    %c0_1 = arith.constant 0 : index
    %c0_2 = arith.constant 0 : index
    %1 = vector.load %arg2[%c0_1, %c0_2] : memref<16x32xf32, #tpu.memory_space<vmem>>, vector<16x32xf32>
    %c0_3 = arith.constant 0 : index
    %c0_4 = arith.constant 0 : index
    %2 = vector.load %arg3[%c0_3, %c0_4] : memref<1x32xf32, #tpu.memory_space<vmem>>, vector<1x32xf32>
    %cst = arith.constant dense<0.000000e+00> : vector<32x32xf32>
    %3 = tpu.matmul %0, %1, %cst {dimension_numbers = #tpu.dot_dimension_numbers<[1], [0], [0], [1], [0, 0, 1, 1], [], []>} : vector<32x16xf32>, vector<16x32xf32>, vector<32x32xf32> -> vector<32x32xf32>
    %4 = vector.broadcast %2 : vector<1x32xf32> to vector<32x32xf32>
    %5 = arith.addf %3, %4 : vector<32x32xf32>
    %cst_5 = arith.constant 0.000000e+00 : f32
    %6 = vector.broadcast %cst_5 : f32 to vector<32x32xf32>
    %7 = arith.maximumf %5, %6 : vector<32x32xf32>
    %c0_6 = arith.constant 0 : index
    %c0_7 = arith.constant 0 : index
    %8 = vector.load %arg4[%c0_6, %c0_7] : memref<32x32xf32, #tpu.memory_space<vmem>>, vector<32x32xf32>
    %c0_8 = arith.constant 0 : index
    %c0_9 = arith.constant 0 : index
    %9 = vector.load %arg5[%c0_8, %c0_9] : memref<1x32xf32, #tpu.memory_space<vmem>>, vector<1x32xf32>
    %cst_10 = arith.constant dense<0.000000e+00> : vector<32x32xf32>
    %10 = tpu.matmul %7, %8, %cst_10 {dimension_numbers = #tpu.dot_dimension_numbers<[1], [0], [0], [1], [0, 0, 1, 1], [], []>} : vector<32x32xf32>, vector<32x32xf32>, vector<32x32xf32> -> vector<32x32xf32>
    %11 = vector.broadcast %9 : vector<1x32xf32> to vector<32x32xf32>
    %12 = arith.addf %10, %11 : vector<32x32xf32>
    %cst_11 = arith.constant 0.000000e+00 : f32
    %13 = vector.broadcast %cst_11 : f32 to vector<32x32xf32>
    %14 = arith.maximumf %12, %13 : vector<32x32xf32>
    %c0_12 = arith.constant 0 : index
    %c0_13 = arith.constant 0 : index
    %15 = vector.load %arg6[%c0_12, %c0_13] : memref<32x1xf32, #tpu.memory_space<vmem>>, vector<32x1xf32>
    %c0_14 = arith.constant 0 : index
    %c0_15 = arith.constant 0 : index
    %16 = vector.load %arg7[%c0_14, %c0_15] : memref<1x1xf32, #tpu.memory_space<vmem>>, vector<1x1xf32>
    %cst_16 = arith.constant dense<0.000000e+00> : vector<32x1xf32>
    %17 = tpu.matmul %14, %15, %cst_16 {dimension_numbers = #tpu.dot_dimension_numbers<[1], [0], [0], [1], [0, 0, 1, 1], [], []>} : vector<32x32xf32>, vector<32x1xf32>, vector<32x1xf32> -> vector<32x1xf32>
    %18 = vector.broadcast %16 : vector<1x1xf32> to vector<32x1xf32>
    %19 = arith.addf %17, %18 : vector<32x1xf32>
    %c0_17 = arith.constant 0 : index
    %c0_18 = arith.constant 0 : index
    %20 = vector.load %arg8[%c0_17, %c0_18] : memref<32x1xf32, #tpu.memory_space<vmem>>, vector<32x1xf32>
    tpu.vector_store %arg8[%c0_17, %c0_18], %19 {strides = array<i32>} : memref<32x1xf32, #tpu.memory_space<vmem>>, vector<32x1xf32>,
    return
  }
  func.func @transform_0(%arg0: i32) -> (i32, i32) {
    %c0_i32 = arith.constant 0 : i32
    %c0_i32_0 = arith.constant 0 : i32
    return %arg0, %c0_i32 : i32, i32
  }
  func.func @transform_1(%arg0: i32) -> (i32, i32) {
    %c0_i32 = arith.constant 0 : i32
    %c0_i32_0 = arith.constant 0 : i32
    %c0_i32_1 = arith.constant 0 : i32
    return %c0_i32, %c0_i32_0 : i32, i32
  }
  func.func @transform_2(%arg0: i32) -> (i32, i32) {
    %c0_i32 = arith.constant 0 : i32
    %c0_i32_0 = arith.constant 0 : i32
    %c0_i32_1 = arith.constant 0 : i32
    return %c0_i32, %c0_i32_0 : i32, i32
  }
  func.func @transform_3(%arg0: i32) -> (i32, i32) {
    %c0_i32 = arith.constant 0 : i32
    %c0_i32_0 = arith.constant 0 : i32
    %c0_i32_1 = arith.constant 0 : i32
    return %c0_i32, %c0_i32_0 : i32, i32
  }
  func.func @transform_4(%arg0: i32) -> (i32, i32) {
    %c0_i32 = arith.constant 0 : i32
    %c0_i32_0 = arith.constant 0 : i32
    %c0_i32_1 = arith.constant 0 : i32
    return %c0_i32, %c0_i32_0 : i32, i32
  }
  func.func @transform_5(%arg0: i32) -> (i32, i32) {
    %c0_i32 = arith.constant 0 : i32
    %c0_i32_0 = arith.constant 0 : i32
    %c0_i32_1 = arith.constant 0 : i32
    return %c0_i32, %c0_i32_0 : i32, i32
  }
  func.func @transform_6(%arg0: i32) -> (i32, i32) {
    %c0_i32 = arith.constant 0 : i32
    %c0_i32_0 = arith.constant 0 : i32
    %c0_i32_1 = arith.constant 0 : i32
    return %c0_i32, %c0_i32_0 : i32, i32
  }
  func.func @transform_7(%arg0: i32) -> (i32, i32) {
    %c0_i32 = arith.constant 0 : i32
    %c0_i32_0 = arith.constant 0 : i32
    return %arg0, %c0_i32 : i32, i32
  }
}

</mosaic_0001>

<bundles_post_ra>
// kernel: tpu_custom_call.1
= control target key start
LH: loop header
LB: loop body
LE: loop exit
PB: predicated region body
PF: predicated region fallthrough
CT: control target
= control target key end

     0   :  { %s826_s26 = smov 0   ;;  %s894_s0 = inlined_call_operand.vmem [shape: f32[64,16], index: 0, kind: input, shape index: {}]   ;;  %s895_s1 = inlined_call_operand.vmem [shape: f32[16,32], index: 1, kind: input, shape index: {}]   ;;  %s896_s2 = inlined_call_operand.vmem [shape: f32[1,32], index: 2, kind: input, shape index: {}]   ;;  %s897_s3 = inlined_call_operand.vmem [shape: f32[32,32], index: 3, kind: input, shape index: {}]   ;;  %s898_s4 = inlined_call_operand.vmem [shape: f32[1,32], index: 4, kind: input, shape index: {}]   ;;  %s899_s5 = inlined_call_operand.vmem [shape: f32[32,1], index: 5, kind: input, shape index: {}]   ;;  %s900_s6 = inlined_call_operand.<no memory space> [shape: f32[1,1], index: 6, kind: input, shape index: {}]   ;;  %s901_s7 = inlined_call_operand.vmem [shape: f32[64,1], index: 7, kind: output, shape index: {}]  }
   0x1   :  { %v12_v0 = vstv %s900_s6 }
   0x2   :  { %13 = vst [vmem:[#allocation2] sm:$0x1] %v12_v0 }
   0x3 LB: > { %s681_s27 = sadd.s32 4294967295, %s781_s26   ;;  %p685_p0 = scmp.ge.s32.totalorder %s781_s26, 1  ;;  %s781_s26 = sphi %s826_s26, %s19_s26  }
   0x4   : > { %p240_p1 = scmp.lt.s32.totalorder %s781_s26, 3 }
   0x6   : > { %p241_p2 = pnand %p685_p0, %p240_p1 }
   0x7   : > { %s686_s8 = sshll.u32 (!%p241_p2), %s681_s27, 2 }
   0x8   : > { %244 = sbr.rel (%p241_p2) target bundleno = 620 (0x26c), region = 48  ;;  %p273_p3 = scmp.lt.s32.totalorder (!%p241_p2), %s686_s8, 7 }
   0xd   : > { %v289_v1 = vld [vmem:[%s895_s1 + $0x8] sm:$0xff]  ;;  %v288_v2 = vld [vmem:[%s895_s1] sm:$0xff]  ;;  %s903_s8 = smov (!%p273_p3, %s686_s8), 7  ;;  %vm297_vm0 = vcmask 130048   ;;  %v402_v7 = vld [vmem:[%s897_s3 + $0x18] sm:$0xff]  ;;  %vm410_vm1 = vcmask 261120  }
   0xe   : > { %729 = vmatprep.subr.mxu0 %v289_v1  ;;  %s687_s9 = sshll.u32 %s903_s8, 3  ;;  %739 = vmatprep.subr.mxu1 %v402_v7  ;;  %v401_v8 = vld [vmem:[%s897_s3 + $0x10] sm:$0xff]  ;;  %v400_v9 = vld [vmem:[%s897_s3 + $0x8] sm:$0xff]  ;;  %v399_v10 = vld [vmem:[%s897_s3] sm:$0xff]  ;;  %vm620_vm2 = vcmask 7168  }
   0xf   : > { %730 = vmatpush3.msra.mxu0 %v289_v1  ;;  %s276_s12 = scalar_lea.vmem %s894_s0, %s687_s9  ;;  %740 = vmatpush3.msra.mxu1 %v402_v7  ;;  %v515_v11 = vld [vmem:[%s899_s5 + $0x18] sm:$0xff]  ;;  %v690_v12 = vld [vmem:[%s896_s2] ss:$0 sm:$0xff]  ;;  %v514_v25 = vld [vmem:[%s899_s5 + $0x10] sm:$0xff]  ;;  %s282_s14 = scalar_lea.vmem %s901_s7, %s687_s9 }
  0x10   : > { %731 = vmatprep.subr.mxu0 %v288_v2  ;;  %v284_v3 = vld [vmem:[%s276_s12] sm:$0xff]  ;;  %v285_v4 = vld [vmem:[%s276_s12 + $0x8] sm:$0xff]  ;;  %v286_v5 = vld [vmem:[%s276_s12 + $0x10] sm:$0xff]  ;;  %741 = vmatprep.subr.mxu1 %v401_v8 }
  0x11   : > { %732 = vmatpush3.msra.mxu0 %v288_v2  ;;  %733 = vmatprep.mubr.msk.f32.mxu0 %vm297_vm0, %v284_v3  ;;  %v287_v6 = vld [vmem:[%s276_s12 + $0x18] sm:$0xff]  ;;  %v513_v26 = vld [vmem:[%s899_s5 + $0x8] sm:$0xff]  ;;  %v512_v27 = vld [vmem:[%s899_s5] sm:$0xff] }
  0x12   : > { %734 = vmatmul.mubr.msk.f32.vlgmr.msra.gmra.mxu0 %vm297_vm0, %v285_v4  ;;  %742 = vmatpush3.msra.mxu1 %v401_v8  ;;  %v695_v28 = vld [vmem:[%s898_s4] ss:$0 sm:$0xff] }
  0x13   : > { %736 = vmatprep.mubr.msk.f32.mxu0 %vm297_vm0, %v286_v5  ;;  %743 = vmatprep.subr.mxu1 %v400_v9  ;;  %v700_v42 = vld [vmem:[#allocation2] ss:$0 sm:$0xff] }
  0x14   : > { %744 = vmatpush3.msra.mxu1 %v400_v9  ;;  %753 = vmatprep.subr.mxu0 %v515_v11 }
  0x15   : > { %745 = vmatprep.subr.mxu1 %v399_v10  ;;  %754 = vmatpush3.msra.mxu0 %v515_v11 }
  0x16   : > { %737 = vmatmul.mubr.msk.f32.gmra.mxu0 %vm297_vm0, %v287_v6  ;;  %746 = vmatpush3.msra.mxu1 %v399_v10 }
  0x17   : > { %755 = vmatprep.subr.mxu0 %v514_v25 }
  0x18   : > { %756 = vmatpush3.msra.mxu0 %v514_v25 }
  0x19   : > { %757 = vmatprep.subr.mxu0 %v513_v26 }
  0x1a   : > { %758 = vmatpush3.msra.mxu0 %v513_v26 }
  0x1b   : > { %759 = vmatprep.subr.mxu0 %v512_v27 }
  0x1c   : > { %760 = vmatpush3.msra.mxu0 %v512_v27 }
  0xd2   : > { %v735_v13 = vpop.f32.mrf.mxu0 }
  0xd3   : > { %v382_v14 = vadd.f32 %v735_v13, %v690_v12 }
  0xd4   : > { %v376_v15 = vpop.f32.mrf.mxu0 }
  0xd5   : > { %v377_v16 = vadd.f32 %v690_v12, %v376_v15  ;;  %v396_v19 = vmax.f32 %v382_v14, 0.0 }
  0xd6   : > { %v738_v17 = vpop.f32.mrf.mxu0 }
  0xd7   : > { %v395_v18 = vmax.f32 %v377_v16, 0.0  ;;  %v392_v20 = vadd.f32 %v738_v17, %v690_v12 }
  0xd8   : > { %v386_v21 = vpop.f32.mrf.mxu0 }
  0xd9   : > { %v387_v22 = vadd.f32 %v690_v12, %v386_v21  ;;  %747 = vmatprep.mubr.msk.f32.mxu1 %vm410_vm1, %v395_v18  ;;  %v398_v24 = vmax.f32 %v392_v20, 0.0 }
  0xda   : > { %748 = vmatmul.mubr.msk.f32.vlgmr.msra.gmra.mxu1 %vm410_vm1, %v396_v19 }
  0xdb   : > { %v397_v23 = vmax.f32 %v387_v22, 0.0 }
  0xdd   : > { %750 = vmatprep.mubr.msk.f32.mxu1 %vm410_vm1, %v397_v23 }
  0xde   : > { %751 = vmatmul.mubr.msk.f32.gmra.mxu1 %vm410_vm1, %v398_v24 }
 0x19a   : > { %v749_v29 = vpop.f32.mrf.mxu1 }
 0x19b   : > { %v495_v30 = vadd.f32 %v749_v29, %v695_v28 }
 0x19c   : > { %v489_v31 = vpop.f32.mrf.mxu1 }
 0x19d   : > { %v490_v32 = vadd.f32 %v695_v28, %v489_v31  ;;  %v509_v35 = vmax.f32 %v495_v30, 0.0 }
 0x19e   : > { %v752_v33 = vpop.f32.mrf.mxu1 }
 0x19f   : > { %v508_v34 = vmax.f32 %v490_v32, 0.0  ;;  %v505_v36 = vadd.f32 %v752_v33, %v695_v28 }
 0x1a0   : > { %v499_v37 = vpop.f32.mrf.mxu1 }
 0x1a1   : > { %v500_v38 = vadd.f32 %v695_v28, %v499_v37  ;;  %761 = vmatprep.mubr.msk.f32.mxu0 %vm410_vm1, %v508_v34  ;;  %v511_v40 = vmax.f32 %v505_v36, 0.0 }
 0x1a2   : > { %762 = vmatmul.mubr.msk.f32.vlgmr.msra.gmra.mxu0 %vm410_vm1, %v509_v35 }
 0x1a3   : > { %v510_v39 = vmax.f32 %v500_v38, 0.0 }
 0x1a5   : > { %764 = vmatprep.mubr.msk.f32.mxu0 %vm410_vm1, %v510_v39 }
 0x1a6   : > { %765 = vmatmul.mubr.msk.f32.gmra.mxu0 %vm410_vm1, %v511_v40 }
 0x262   : > { %v763_v41 = vpop.f32.mrf.mxu0 }
 0x263   : > { %v607_v45 = vadd.f32 %v763_v41, %v700_v42 }
 0x264   : > { %v601_v43 = vpop.f32.mrf.mxu0 }
 0x265   : > { %v602_v44 = vadd.f32 %v700_v42, %v601_v43  ;;  %622 = vst.msk [vmem:[%s282_s14 + $0x8] sm:$0xff] %vm620_vm2, %v607_v45 }
 0x266   : > { %v766_v46 = vpop.f32.mrf.mxu0 }
 0x267   : > { %621 = vst.msk [vmem:[%s282_s14] sm:$0xff] %vm620_vm2, %v602_v44  ;;  %v617_v49 = vadd.f32 %v766_v46, %v700_v42 }
 0x268   : > { %v611_v47 = vpop.f32.mrf.mxu0 }
 0x269   : > { %v612_v48 = vadd.f32 %v700_v42, %v611_v47  ;;  %624 = vst.msk [vmem:[%s282_s14 + $0x18] sm:$0xff] %vm620_vm2, %v617_v49 }
 0x26b   : > { %623 = vst.msk [vmem:[%s282_s14 + $0x10] sm:$0xff] %vm620_vm2, %v612_v48 }
 0x26c PF: > { %s19_s26 = sadd.s32 1, %s781_s26  }
 0x26d   : > { %p16_p4 = scmp.ge.s32.totalorder %s19_s26, 4  }
 0x26f   :  { %18 = sbr.rel (!%p16_p4) target bundleno = 3 (0x3), region = 78 }

</bundles_post_ra>
